<compile_context>
chip_gen: v7x
topology: tpu7x:2x2x1
jax: 0.10.0
libtpu: 0.0.40
codegen_flags: <defaults>
</compile_context>

<pallas_src>
import functools

import jax
import jax.numpy as jnp
from jax.experimental import pallas as pl
from jax.experimental.pallas import tpu as pltpu


def _round_up(v: int, m: int) -> int:
    return ((v + m - 1) // m) * m


def _pad2d(a, rows: int, cols: int):
    pr, pc = rows - a.shape[0], cols - a.shape[1]
    if pr or pc:
        a = jnp.pad(a, ((0, pr), (0, pc)))
    return a


def _pick_row_tile(np_rows, k_cols, dop, resident_bytes, cd_itemsize, apply_dropout,
                   budget_bytes=20 * 1024 * 1024):
    """Largest row tile whose double-buffered working set fits a conservative VMEM budget."""
    for tm in (512, 256, 128):
        if np_rows % tm:
            continue
        need = 2 * tm * k_cols * cd_itemsize      # adj row tile (double-buffered)
        need += 2 * tm * dop * 4                  # f32 output tile (double-buffered)
        if apply_dropout:
            need += 2 * tm * dop * 4              # dropout-uniforms tile
        need += 2 * resident_bytes                # resident x / W.T / bias (x2 conservative)
        if need <= budget_bytes:
            return tm
    # TODO(synk): tile the contraction (K) axis with a VMEM accumulator (pl.when init/
    # finalize) for graphs whose resident x / W.T blocks no longer fit VMEM at tm=128.
    return 128


def _gcn_kernel(*refs, has_input: bool, add_bias: bool, apply_dropout: bool,
                dropout_rate: float):
    it = iter(refs)
    adj_ref = next(it)
    x_ref = next(it) if has_input else None
    wT_ref = next(it)
    b_ref = next(it) if add_bias else None
    u_ref = next(it) if apply_dropout else None
    out_ref = next(it)

    adj = adj_ref[...]                                      # (tm, K) compute dtype (bf16)
    if has_input:
        # h = adj @ x  — bf16 MXU inputs, f32 accumulation.
        h = jnp.dot(adj, x_ref[...], preferred_element_type=jnp.float32)
        h = h.astype(wT_ref.dtype)
    else:
        h = adj                                             # outputs = adjacent_matrix

    # Linear: y = h @ W.T (+ b), f32 accumulation.
    y = jnp.dot(h, wT_ref[...], preferred_element_type=jnp.float32)
    if add_bias:
        y = y + b_ref[...].astype(jnp.float32)

    # ReLU (f32 epilogue).
    y = jnp.maximum(y, 0.0)

    # Dropout: keep where u >= p, scale kept values by 1/(1-p)  (nn.Dropout semantics).
    if apply_dropout:
        keep = u_ref[...] >= jnp.float32(dropout_rate)
        y = jnp.where(keep, y * jnp.float32(1.0 / (1.0 - dropout_rate)), 0.0)

    out_ref[...] = y.astype(out_ref.dtype)


def _xavier_uniform(key, d_out, d_in):
    # nn.init.xavier_uniform_ on weight of shape (d_out, d_in)
    bound = float(jnp.sqrt(6.0 / (d_in + d_out)))
    return jax.random.uniform(key, (d_out, d_in), jnp.float32, -bound, bound)


class GraphConvolutionalLayerPallas:
    def __init__(self, dim_input: int, dim_output: int, dropout_rate: float = 0.1,
                 *, key=None, compute_dtype=jnp.bfloat16):
        if key is None:
            key = jax.random.PRNGKey(0)
        self.dim_input = int(dim_input)
        self.dim_output = int(dim_output)
        self.dropout_rate = float(dropout_rate)
        self.compute_dtype = compute_dtype
        self.weight = _xavier_uniform(key, self.dim_output, self.dim_input)  # (D_out, D_in)
        self.bias = jnp.zeros((self.dim_output,), jnp.float32)               # constant_(0)

    def __call__(self, input_embs, adjacent_matrix, *, training: bool = False,
                 seed: int = 0, rng_key=None):
        cd = self.compute_dtype
        d_in, d_out = self.dim_input, self.dim_output

        adj = jnp.asarray(adjacent_matrix, jnp.float32)
        has_input = input_embs is not None
        n_rows = adj.shape[0]
        if has_input:
            x = jnp.asarray(input_embs, jnp.float32)
            assert adj.shape[1] == x.shape[0] and x.shape[1] == d_in
            k_cols = adj.shape[1]
        else:
            # outputs = adjacent_matrix fed straight into the Linear -> needs cols == dim_input
            assert adj.shape[1] == d_in, (
                "input_embs=None requires adjacent_matrix.shape[1] == dim_input")
            k_cols = d_in

        # Lane/sublane-friendly padded sizes (multiples of 128).
        np_rows = _round_up(n_rows, 128)
        dip = _round_up(d_in, 128)
        dop = _round_up(d_out, 128)
        kp = _round_up(k_cols, 128) if has_input else dip

        add_bias = bool(jnp.any(self.bias != 0))            # bias is zero-init -> folded out
        apply_dropout = bool(training) and self.dropout_rate > 0.0

        # Padded operands (zero padding keeps the math exact; padding sliced off at the end).
        adj_p = _pad2d(adj, np_rows, kp).astype(cd)
        wT_p = _pad2d(self.weight.T, dip, dop).astype(cd)   # (D_in, D_out) -> (dip, dop)
        x_p = _pad2d(x, kp, dip).astype(cd) if has_input else None
        b_p = _pad2d(self.bias.reshape(1, d_out), 1, dop) if add_bias else None
        if apply_dropout:
            if rng_key is None:
                rng_key = jax.random.PRNGKey(seed)
            u_p = jax.random.uniform(rng_key, (np_rows, dop), jnp.float32)
        else:
            u_p = None

        cd_itemsize = jnp.dtype(cd).itemsize
        resident_bytes = wT_p.size * cd_itemsize
        if has_input:
            resident_bytes += x_p.size * cd_itemsize
        if add_bias:
            resident_bytes += dop * 4
        tm = _pick_row_tile(np_rows, kp, dop, resident_bytes, cd_itemsize, apply_dropout)
        grid = (np_rows // tm,)

        # Inputs: adj row tiles stream through the grid; x / W.T / bias stay resident.
        inputs = [adj_p]
        in_specs = [pl.BlockSpec((tm, kp), lambda i: (i, 0))]
        if has_input:
            inputs.append(x_p)
            in_specs.append(pl.BlockSpec((kp, dip), lambda i: (0, 0)))
        inputs.append(wT_p)
        in_specs.append(pl.BlockSpec((dip, dop), lambda i: (0, 0)))
        if add_bias:
            inputs.append(b_p)
            in_specs.append(pl.BlockSpec((1, dop), lambda i: (0, 0)))
        if apply_dropout:
            inputs.append(u_p)
            in_specs.append(pl.BlockSpec((tm, dop), lambda i: (i, 0)))

        kernel = functools.partial(
            _gcn_kernel, has_input=has_input, add_bias=add_bias,
            apply_dropout=apply_dropout, dropout_rate=self.dropout_rate)

        flops = 2 * np_rows * dip * dop
        if has_input:
            flops += 2 * np_rows * kp * dip
        bytes_accessed = sum(int(a.size) * a.dtype.itemsize for a in inputs)
        bytes_accessed += np_rows * dop * 4

        out_p = pl.pallas_call(
            kernel,
            out_shape=jax.ShapeDtypeStruct((np_rows, dop), jnp.float32),
            grid=grid,
            in_specs=in_specs,
            out_specs=pl.BlockSpec((tm, dop), lambda i: (i, 0)),
            compiler_params=pltpu.CompilerParams(
                dimension_semantics=("parallel",)),        # megacore split on v7x
            cost_estimate=pl.CostEstimate(
                flops=flops, transcendentals=0, bytes_accessed=bytes_accessed),
        )(*inputs)

        return out_p[:n_rows, :d_out]


if __name__ == "__main__":
    key = jax.random.PRNGKey(0)
    k_w, k_w2, k_adj, k_x = jax.random.split(key, 4)

    N, D_IN, D_OUT = 16, 32, 64
    layer = GraphConvolutionalLayerPallas(D_IN, D_OUT, dropout_rate=0.1, key=k_w)

    adj = jax.random.uniform(k_adj, (N, N), jnp.float32)
    x = jax.random.normal(k_x, (N, D_IN), jnp.float32)

    # --- eval-mode forward (dropout is identity) ---
    out = jax.block_until_ready(layer(x, adj, training=False))
    assert out.shape == (N, D_OUT)

    # Reference with matched bf16 rounding of the matmul operands (f32 accumulation).
    f32, cd = jnp.float32, jnp.bfloat16
    h_ref = jnp.dot(adj.astype(cd).astype(f32), x.astype(cd).astype(f32))
    y_ref = jnp.dot(h_ref.astype(cd).astype(f32), layer.weight.T.astype(cd).astype(f32))
    ref = jnp.maximum(y_ref + layer.bias, 0.0)
    assert jnp.allclose(out, ref, atol=2e-2, rtol=2e-2), float(jnp.max(jnp.abs(out - ref)))

    # --- training-mode forward (host-side RNG, in-kernel dropout mask/scale) ---
    out_tr = jax.block_until_ready(layer(x, adj, training=True, seed=42))
    assert out_tr.shape == (N, D_OUT)
    assert bool(jnp.all(jnp.isfinite(out_tr)))

    # --- input_embs=None path: adjacency fed straight into the Linear (dim_input == N) ---
    layer2 = GraphConvolutionalLayerPallas(N, D_OUT, dropout_rate=0.1, key=k_w2)
    out2 = jax.block_until_ready(layer2(None, adj, training=False))
    y2_ref = jnp.dot(adj.astype(cd).astype(f32), layer2.weight.T.astype(cd).astype(f32))
    ref2 = jnp.maximum(y2_ref + layer2.bias, 0.0)
    assert out2.shape == (N, D_OUT)
    assert jnp.allclose(out2, ref2, atol=2e-2, rtol=2e-2)

    print("KERNEL_OK")
</pallas_src>

<mosaic_0001>
module attributes {stable_mosaic.version = 11 : i64} {
  func.func @_gcn_kernel(%arg0: i32, %arg1: memref<128x128xbf16, #tpu.memory_space<vmem>>, %arg2: memref<128x128xbf16, #tpu.memory_space<vmem>>, %arg3: memref<128x128xbf16, #tpu.memory_space<vmem>>, %arg4: memref<128x128xf32, #tpu.memory_space<vmem>>) attributes {dimension_semantics = [#tpu.dimension_semantics<parallel>], iteration_bounds = array<i64: 1>, scalar_prefetch = 0 : i64, scratch_operands = 0 : i64, tpu.core_type = #tpu.core_type<tc>, window_params = [{transform_indices = @transform_0, window_bounds = array<i64: 128, 128>}, {pipeline_mode = #tpu.pipeline_mode<synchronous>, transform_indices = @transform_1, window_bounds = array<i64: 128, 128>}, {pipeline_mode = #tpu.pipeline_mode<synchronous>, transform_indices = @transform_2, window_bounds = array<i64: 128, 128>}, {transform_indices = @transform_3, window_bounds = array<i64: 128, 128>}]} {
    %c0 = arith.constant 0 : index
    %c0_0 = arith.constant 0 : index
    %0 = vector.load %arg1[%c0, %c0_0] : memref<128x128xbf16, #tpu.memory_space<vmem>>, vector<128x128xbf16>
    %c0_1 = arith.constant 0 : index
    %c0_2 = arith.constant 0 : index
    %1 = vector.load %arg2[%c0_1, %c0_2] : memref<128x128xbf16, #tpu.memory_space<vmem>>, vector<128x128xbf16>
    %cst = arith.constant dense<0.000000e+00> : vector<128x128xf32>
    %2 = tpu.matmul %0, %1, %cst {dimension_numbers = #tpu.dot_dimension_numbers<[1], [0], [0], [1], [0, 0, 1, 1], [], []>} : vector<128x128xbf16>, vector<128x128xbf16>, vector<128x128xf32> -> vector<128x128xf32>
    %3 = arith.truncf %2 : vector<128x128xf32> to vector<128x128xbf16>
    %c0_3 = arith.constant 0 : index
    %c0_4 = arith.constant 0 : index
    %4 = vector.load %arg3[%c0_3, %c0_4] : memref<128x128xbf16, #tpu.memory_space<vmem>>, vector<128x128xbf16>
    %cst_5 = arith.constant dense<0.000000e+00> : vector<128x128xf32>
    %5 = tpu.matmul %3, %4, %cst_5 {dimension_numbers = #tpu.dot_dimension_numbers<[1], [0], [0], [1], [0, 0, 1, 1], [], []>} : vector<128x128xbf16>, vector<128x128xbf16>, vector<128x128xf32> -> vector<128x128xf32>
    %cst_6 = arith.constant 0.000000e+00 : f32
    %6 = vector.broadcast %cst_6 : f32 to vector<128x128xf32>
    %7 = arith.maximumf %5, %6 : vector<128x128xf32>
    %c0_7 = arith.constant 0 : index
    %c0_8 = arith.constant 0 : index
    %8 = vector.load %arg4[%c0_7, %c0_8] : memref<128x128xf32, #tpu.memory_space<vmem>>, vector<128x128xf32>
    tpu.vector_store %arg4[%c0_7, %c0_8], %7 {strides = array<i32>} : memref<128x128xf32, #tpu.memory_space<vmem>>, vector<128x128xf32>,
    return
  }
  func.func @transform_0(%arg0: i32) -> (i32, i32) {
    %c0_i32 = arith.constant 0 : i32
    %c0_i32_0 = arith.constant 0 : i32
    return %arg0, %c0_i32 : i32, i32
  }
  func.func @transform_1(%arg0: i32) -> (i32, i32) {
    %c0_i32 = arith.constant 0 : i32
    %c0_i32_0 = arith.constant 0 : i32
    %c0_i32_1 = arith.constant 0 : i32
    return %c0_i32, %c0_i32_0 : i32, i32
  }
  func.func @transform_2(%arg0: i32) -> (i32, i32) {
    %c0_i32 = arith.constant 0 : i32
    %c0_i32_0 = arith.constant 0 : i32
    %c0_i32_1 = arith.constant 0 : i32
    return %c0_i32, %c0_i32_0 : i32, i32
  }
  func.func @transform_3(%arg0: i32) -> (i32, i32) {
    %c0_i32 = arith.constant 0 : i32
    %c0_i32_0 = arith.constant 0 : i32
    return %arg0, %c0_i32 : i32, i32
  }
}

</mosaic_0001>

<bundles_post_ra>
// kernel: tpu_custom_call.1
= control target key start
LH: loop header
LB: loop body
LE: loop exit
PB: predicated region body
PF: predicated region fallthrough
CT: control target
= control target key end

     0   :  { %8 = vsyncpa [#allocation3], 0  ;;  %s839_s0 = inlined_call_operand.hbm [shape: bf16[128,128], index: 0, kind: input, shape index: {}]   ;;  %s840_s1 = inlined_call_operand.hbm [shape: bf16[128,128], index: 1, kind: input, shape index: {}]   ;;  %s841_s2 = inlined_call_operand.hbm [shape: bf16[128,128], index: 2, kind: input, shape index: {}]   ;;  %s842_s3 = inlined_call_operand.hbm [shape: f32[128,128], index: 3, kind: output, shape index: {}]  }
   0x1   :  { %9 = vsyncpa [#allocation6], 0 }
   0x2   :  { %10 = vsyncpa [#allocation4], 0  ;;  %s747_s12 = smov [#allocation5]   ;;  %s748_s14 = smov [#allocation2]  }
   0x3   :  { %s28_s13 = sshll.u32 %s747_s12, 4  ;;  %s16_s15 = sshll.u32 %s748_s14, 4  ;;  %s29_s13 = int_to_ptr.vmem [resolvable:$true] %s28_s13  ;;  %s775_s15 = int_to_ptr.vmem [resolvable:$true] %s16_s15 }
   0x4   :  { %s653_s18 = scalar_lea.hbm %s840_s1, 1024 }
   0x5   :  { %p654_p0 = scmp.ne.s32.totalorder %s840_s1, %s653_s18  ;;  %p657_p1 = scmp.lt.u32.totalorder %s653_s18, %s840_s1 }
   0x7   :  { %p659_p2 = pnand %p657_p1, %p654_p0 }
   0x9   :  { %662 = shalt.err (!%p659_p2)
}
   0xa   :  { %s663_s23 = scalar_lea.vmem %s29_s13, 1024  ;;  %p668_p4 = scmp.lt.s32.totalorder %s29_s13, %s29_s13 }
   0xb   :  { %p664_p3 = scmp.ne.s32.totalorder %s29_s13, %s663_s23  ;;  %p669_p5 = scmp.lt.s32.totalorder %s663_s23, %s663_s23 }
   0xd   :  { %p670_p6 = por %p669_p5, %p668_p4 }
   0xf   :  { %p671_p7 = pnand %p670_p6, %p664_p3 }
  0x11   :  { %674 = shalt.err (!%p671_p7)
}
  0x12   :  { %s749_s24 = smov 64   ;;  %s750_s25 = smov 4  }
  0x13   :  { %34 = dma.hbm_to_vmem [thread:$0]  %s840_s1, 1024, %s29_s13, [#allocation6], %s749_s24, %s749_s24, %s750_s25  }
  0x14   :  { %s675_s30 = scalar_lea.hbm %s839_s0, 1024 }
  0x15   :  { %p676_p8 = scmp.ne.s32.totalorder %s839_s0, %s675_s30  ;;  %p679_p9 = scmp.lt.u32.totalorder %s675_s30, %s839_s0 }
  0x17   :  { %p681_p10 = pnand %p679_p9, %p676_p8 }
  0x19   :  { %684 = shalt.err (!%p681_p10)
}
  0x1a   :  { %s685_s8 = scalar_lea.vmem %s775_s15, 1024  ;;  %p690_p12 = scmp.lt.s32.totalorder %s775_s15, %s775_s15 }
  0x1b   :  { %p686_p11 = scmp.ne.s32.totalorder %s775_s15, %s685_s8  ;;  %p691_p13 = scmp.lt.s32.totalorder %s685_s8, %s685_s8 }
  0x1d   :  { %p692_p0 = por %p691_p13, %p690_p12 }
  0x1f   :  { %p693_p1 = pnand %p692_p0, %p686_p11 }
  0x21   :  { %696 = shalt.err (!%p693_p1)
}
  0x22   :  { %22 = dma.hbm_to_vmem [thread:$0]  %s839_s0, 1024, %s775_s15, [#allocation3], %s749_s24, %s749_s24, %s750_s25  }
  0x23   :  { %s751_s10 = smov [#allocation7]   ;;  %s697_s14 = scalar_lea.hbm %s841_s2, 1024 }
  0x24   :  { %s40_s11 = sshll.u32 %s751_s10, 4  ;;  %p698_p2 = scmp.ne.s32.totalorder %s841_s2, %s697_s14  ;;  %s41_s11 = int_to_ptr.vmem [resolvable:$true] %s40_s11 }
  0x25   :  { %p701_p3 = scmp.lt.u32.totalorder %s697_s14, %s841_s2 }
  0x27   :  { %p703_p4 = pnand %p701_p3, %p698_p2 }
  0x29   :  { %706 = shalt.err (!%p703_p4)
}
  0x2a   :  { %s707_s20 = scalar_lea.vmem %s41_s11, 1024  ;;  %p712_p6 = scmp.lt.s32.totalorder %s41_s11, %s41_s11 }
  0x2b   :  { %p708_p5 = scmp.ne.s32.totalorder %s41_s11, %s707_s20  ;;  %p713_p7 = scmp.lt.s32.totalorder %s707_s20, %s707_s20 }
  0x2d   :  { %p714_p8 = por %p713_p7, %p712_p6 }
  0x2f   :  { %p715_p9 = pnand %p714_p8, %p708_p5 }
  0x31   :  { %718 = shalt.err (!%p715_p9)
}
  0x32   :  { %46 = dma.hbm_to_vmem [thread:$0]  %s841_s2, 1024, %s41_s11, [#allocation6], %s749_s24, %s749_s24, %s750_s25  }
  0x33   :  { %741 = dma.done.wait [#allocation3], 1024  }
  0x34   :  { %742 = vsyncadd [#allocation3], 4294966272 }
  0x35   :  { %743 = dma.done.wait [#allocation6], 2048  }
  0x36   :  { %744 = vsyncadd [#allocation6], 4294965248  ;;  %v629_v0 = vld [vmem:[#allocation5] sm:$0xff]   ;;  %v630_v1 = vld [vmem:[#allocation5 + $0x8] sm:$0xff]   ;;  %s752_s2 = smov [#allocation8]  }
  0x37   :  { %557 = vmatprep.subr.bf16.mxu0 %v629_v0  ;;  %v631_v2 = vld [vmem:[#allocation5 + $0x10] sm:$0xff]   ;;  %v632_v3 = vld [vmem:[#allocation5 + $0x18] sm:$0xff]   ;;  %v637_v4 = vld [vmem:[#allocation2] sm:$0xff]   ;;  %s488_s21 = sshll.u32 %s752_s2, 4  ;;  %s489_s21 = int_to_ptr.vmem [resolvable:$true] %s488_s21 }
  0x38   :  { %558 = vmatpush3.bf16.msra.mxu0 %v629_v0  ;;  %573 = vmatprep.mubr.bf16.mxu0 %v637_v4  ;;  %v633_v5 = vld [vmem:[#allocation5 + $0x20] sm:$0xff]   ;;  %v634_v6 = vld [vmem:[#allocation5 + $0x28] sm:$0xff]   ;;  %v635_v9 = vld [vmem:[#allocation5 + $0x30] sm:$0xff]   ;;  %s719_s22 = scalar_lea.vmem %s489_s21, 2048  ;;  %p724_p11 = scmp.lt.s32.totalorder %s489_s21, %s489_s21 }
  0x39   :  { %559 = vmatprep.subr.bf16.mxu0 %v630_v1  ;;  %v645_v7 = vld [vmem:[#allocation7] sm:$0xff]   ;;  %v646_v8 = vld [vmem:[#allocation7 + $0x8] sm:$0xff]   ;;  %v647_v10 = vld [vmem:[#allocation7 + $0x10] sm:$0xff]   ;;  %p720_p10 = scmp.ne.s32.totalorder %s489_s21, %s719_s22  ;;  %p725_p12 = scmp.lt.s32.totalorder %s719_s22, %s719_s22 }
  0x3a   :  { %589 = vmatprep.subr.bf16.mxu1 %v645_v7  ;;  %v636_v11 = vld [vmem:[#allocation5 + $0x38] sm:$0xff]   ;;  %v649_v13 = vld [vmem:[#allocation7 + $0x20] sm:$0xff]   ;;  %v638_v14 = vld [vmem:[#allocation2 + $0x8] sm:$0xff]  }
  0x3b   :  { %590 = vmatpush3.bf16.msra.mxu1 %v645_v7  ;;  %v648_v12 = vld [vmem:[#allocation7 + $0x18] sm:$0xff]   ;;  %v639_v15 = vld [vmem:[#allocation2 + $0x10] sm:$0xff]   ;;  %v650_v16 = vld [vmem:[#allocation7 + $0x28] sm:$0xff]   ;;  %p726_p13 = por %p725_p12, %p724_p11 }
  0x3c   :  { %560 = vmatpush3.bf16.msra.mxu0 %v630_v1  ;;  %591 = vmatprep.subr.bf16.mxu1 %v646_v8  ;;  %v651_v17 = vld [vmem:[#allocation7 + $0x30] sm:$0xff]   ;;  %v640_v18 = vld [vmem:[#allocation2 + $0x18] sm:$0xff]   ;;  %v641_v19 = vld [vmem:[#allocation2 + $0x20] sm:$0xff]  }
  0x3d   :  { %561 = vmatprep.subr.bf16.mxu0 %v631_v2  ;;  %v642_v20 = vld [vmem:[#allocation2 + $0x28] sm:$0xff]   ;;  %v643_v21 = vld [vmem:[#allocation2 + $0x30] sm:$0xff]   ;;  %v644_v22 = vld [vmem:[#allocation2 + $0x38] sm:$0xff]   ;;  %p727_p0 = pnand %p726_p13, %p720_p10 }
  0x3e   :  { %v652_v23 = vld [vmem:[#allocation7 + $0x38] sm:$0xff]  }
  0x3f   :  { %592 = vmatpush3.bf16.msra.mxu1 %v646_v8 }
  0x40   :  { %562 = vmatpush3.bf16.msra.mxu0 %v631_v2  ;;  %593 = vmatprep.subr.bf16.mxu1 %v647_v10 }
  0x41   :  { %563 = vmatprep.subr.bf16.mxu0 %v632_v3 }
  0x43   :  { %594 = vmatpush3.bf16.msra.mxu1 %v647_v10 }
  0x44   :  { %564 = vmatpush3.bf16.msra.mxu0 %v632_v3  ;;  %595 = vmatprep.subr.bf16.mxu1 %v648_v12 }
  0x45   :  { %565 = vmatprep.subr.bf16.mxu0 %v633_v5 }
  0x47   :  { %596 = vmatpush3.bf16.msra.mxu1 %v648_v12 }
  0x48   :  { %566 = vmatpush3.bf16.msra.mxu0 %v633_v5  ;;  %597 = vmatprep.subr.bf16.mxu1 %v649_v13 }
  0x49   :  { %567 = vmatprep.subr.bf16.mxu0 %v634_v6 }
  0x4b   :  { %598 = vmatpush3.bf16.msra.mxu1 %v649_v13 }
  0x4c   :  { %568 = vmatpush3.bf16.msra.mxu0 %v634_v6  ;;  %599 = vmatprep.subr.bf16.mxu1 %v650_v16 }
  0x4d   :  { %569 = vmatprep.subr.bf16.mxu0 %v635_v9 }
  0x4f   :  { %600 = vmatpush3.bf16.msra.mxu1 %v650_v16 }
  0x50   :  { %570 = vmatpush3.bf16.msra.mxu0 %v635_v9  ;;  %601 = vmatprep.subr.bf16.mxu1 %v651_v17 }
  0x51   :  { %571 = vmatprep.subr.bf16.mxu0 %v636_v11 }
  0x53   :  { %602 = vmatpush3.bf16.msra.mxu1 %v651_v17 }
  0x54   :  { %572 = vmatpush3.bf16.msra.mxu0 %v636_v11  ;;  %603 = vmatprep.subr.bf16.mxu1 %v652_v23 }
  0x57   :  { %574 = vmatmul.mubr.bf16.vlgmr.msra.gmra.mrb[0].mxu0 %v638_v14  ;;  %604 = vmatpush3.bf16.msra.mxu1 %v652_v23 }
  0x58   :  { %577 = vmatprep.mubr.bf16.mxu0 %v639_v15 }
  0x5f   :  { %578 = vmatmul.mubr.bf16.gmra.mrb[4].mxu0 %v640_v18 }
  0x60   :  { %581 = vmatprep.mubr.bf16.mxu0 %v641_v19 }
  0x67   :  { %582 = vmatmul.mubr.bf16.gmra.mrb[8].mxu0 %v642_v20 }
  0x68   :  { %585 = vmatprep.mubr.bf16.mxu0 %v643_v21 }
  0x6f   :  { %586 = vmatmul.mubr.bf16.gmra.mrb[12].mxu0 %v644_v22 }
 0x12a   :  { %v575_v24 = vpop.f32.mrb[0].mxu0 }
 0x12b   :  { %v219_v25 = vpop.f32.mrb[1].mxu0 }
 0x12c   :  { %v576_v26 = vpop.f32.mrb[2].mxu0 }
 0x12d   :  { %v283_v27 = vpack.c.bf16 %v576_v26, %v575_v24  ;;  %v222_v28 = vpop.f32.mrb[3].mxu0 }
 0x12e   :  { %v282_v29 = vpack.c.bf16 %v222_v28, %v219_v25 }
 0x130   :  { %605 = vmatprep.mubr.bf16.mxu1 %v282_v29 }
 0x131   :  { %606 = vmatmul.mubr.bf16.vlgmr.msra.gmra.mrb[0].mxu1 %v283_v27 }
 0x132   :  { %v579_v30 = vpop.f32.mrb[4].mxu0 }
 0x133   :  { %v235_v31 = vpop.f32.mrb[5].mxu0 }
 0x134   :  { %v580_v32 = vpop.f32.mrb[6].mxu0 }
 0x135   :  { %v285_v33 = vpack.c.bf16 %v580_v32, %v579_v30  ;;  %v238_v34 = vpop.f32.mrb[7].mxu0 }
 0x136   :  { %v284_v35 = vpack.c.bf16 %v238_v34, %v235_v31 }
 0x138   :  { %609 = vmatprep.mubr.bf16.mxu1 %v284_v35 }
 0x139   :  { %610 = vmatmul.mubr.bf16.gmra.mrb[4].mxu1 %v285_v33 }
 0x13a   :  { %v583_v36 = vpop.f32.mrb[8].mxu0 }
 0x13b   :  { %v251_v37 = vpop.f32.mrb[9].mxu0 }
 0x13c   :  { %v584_v38 = vpop.f32.mrb[10].mxu0 }
 0x13d   :  { %v287_v39 = vpack.c.bf16 %v584_v38, %v583_v36  ;;  %v254_v40 = vpop.f32.mrb[11].mxu0 }
 0x13e   :  { %v286_v41 = vpack.c.bf16 %v254_v40, %v251_v37 }
 0x140   :  { %613 = vmatprep.mubr.bf16.mxu1 %v286_v41 }
 0x141   :  { %614 = vmatmul.mubr.bf16.gmra.mrb[8].mxu1 %v287_v39 }
 0x142   :  { %v587_v42 = vpop.f32.mrb[12].mxu0 }
 0x143   :  { %v267_v43 = vpop.f32.mrb[13].mxu0 }
 0x144   :  { %v588_v44 = vpop.f32.mrb[14].mxu0 }
 0x145   :  { %v289_v45 = vpack.c.bf16 %v588_v44, %v587_v42  ;;  %v270_v46 = vpop.f32.mrb[15].mxu0 }
 0x146   :  { %v288_v47 = vpack.c.bf16 %v270_v46, %v267_v43 }
 0x148   :  { %617 = vmatprep.mubr.bf16.mxu1 %v288_v47 }
 0x149   :  { %618 = vmatmul.mubr.bf16.gmra.mrb[12].mxu1 %v289_v45 }
 0x204   :  { %v607_v48 = vpop.f32.mrb[0].mxu1 }
 0x205   :  { %v453_v49 = vmax.f32 %v607_v48, 0.0  ;;  %v388_v50 = vpop.f32.mrb[1].mxu1 }
 0x206   :  { %v451_v51 = vmax.f32 %v388_v50, 0.0  ;;  %v608_v52 = vpop.f32.mrb[2].mxu1 }
 0x207   :  { %469 = vst [vmem:[#allocation8 + $0x10] sm:$0xff] %v453_v49  ;;  %v454_v53 = vmax.f32 %v608_v52, 0.0  ;;  %v391_v54 = vpop.f32.mrb[3].mxu1 }
 0x208   :  { %467 = vst [vmem:[#allocation8] sm:$0xff] %v451_v51  ;;  %v452_v55 = vmax.f32 %v391_v54, 0.0 }
 0x209   :  { %470 = vst [vmem:[#allocation8 + $0x18] sm:$0xff] %v454_v53 }
 0x20a   :  { %468 = vst [vmem:[#allocation8 + $0x8] sm:$0xff] %v452_v55 }
 0x20c   :  { %v611_v56 = vpop.f32.mrb[4].mxu1 }
 0x20d   :  { %v457_v57 = vmax.f32 %v611_v56, 0.0  ;;  %v404_v58 = vpop.f32.mrb[5].mxu1 }
 0x20e   :  { %v455_v59 = vmax.f32 %v404_v58, 0.0  ;;  %v612_v60 = vpop.f32.mrb[6].mxu1 }
 0x20f   :  { %473 = vst [vmem:[#allocation8 + $0x30] sm:$0xff] %v457_v57  ;;  %v458_v61 = vmax.f32 %v612_v60, 0.0  ;;  %v407_v62 = vpop.f32.mrb[7].mxu1 }
 0x210   :  { %471 = vst [vmem:[#allocation8 + $0x20] sm:$0xff] %v455_v59  ;;  %v456_v63 = vmax.f32 %v407_v62, 0.0 }
 0x211   :  { %474 = vst [vmem:[#allocation8 + $0x38] sm:$0xff] %v458_v61 }
 0x212   :  { %472 = vst [vmem:[#allocation8 + $0x28] sm:$0xff] %v456_v63 }
 0x214   :  { %v615_v0 = vpop.f32.mrb[8].mxu1 }
 0x215   :  { %v461_v1 = vmax.f32 %v615_v0, 0.0  ;;  %v420_v2 = vpop.f32.mrb[9].mxu1 }
 0x216   :  { %v459_v3 = vmax.f32 %v420_v2, 0.0  ;;  %v616_v4 = vpop.f32.mrb[10].mxu1 }
 0x217   :  { %477 = vst [vmem:[#allocation8 + $0x50] sm:$0xff] %v461_v1  ;;  %v462_v5 = vmax.f32 %v616_v4, 0.0  ;;  %v423_v6 = vpop.f32.mrb[11].mxu1 }
 0x218   :  { %475 = vst [vmem:[#allocation8 + $0x40] sm:$0xff] %v459_v3  ;;  %v460_v7 = vmax.f32 %v423_v6, 0.0 }
 0x219   :  { %478 = vst [vmem:[#allocation8 + $0x58] sm:$0xff] %v462_v5 }
 0x21a   :  { %476 = vst [vmem:[#allocation8 + $0x48] sm:$0xff] %v460_v7 }
 0x21c   :  { %v619_v8 = vpop.f32.mrb[12].mxu1 }
 0x21d   :  { %v465_v9 = vmax.f32 %v619_v8, 0.0  ;;  %v436_v10 = vpop.f32.mrb[13].mxu1 }
 0x21e   :  { %v463_v11 = vmax.f32 %v436_v10, 0.0  ;;  %v620_v12 = vpop.f32.mrb[14].mxu1 }
 0x21f   :  { %481 = vst [vmem:[#allocation8 + $0x70] sm:$0xff] %v465_v9  ;;  %v466_v13 = vmax.f32 %v620_v12, 0.0  ;;  %v439_v14 = vpop.f32.mrb[15].mxu1 }
 0x220   :  { %479 = vst [vmem:[#allocation8 + $0x60] sm:$0xff] %v463_v11  ;;  %v464_v15 = vmax.f32 %v439_v14, 0.0 }
 0x221   :  { %482 = vst [vmem:[#allocation8 + $0x78] sm:$0xff] %v466_v13 }
 0x222   :  { %480 = vst [vmem:[#allocation8 + $0x68] sm:$0xff] %v464_v15 }
 0x223   :  { %730 = shalt.err (!%p727_p0)
}
 0x224   :  { %s731_s25 = scalar_lea.hbm %s842_s3, 2048 }
 0x225   :  { %p732_p1 = scmp.ne.s32.totalorder %s842_s3, %s731_s25  ;;  %p735_p2 = scmp.lt.u32.totalorder %s731_s25, %s842_s3 }
 0x227   :  { %p737_p3 = pnand %p735_p2, %p732_p1 }
 0x229   :  { %740 = shalt.err (!%p737_p3)
}
 0x22a   :  { %s753_s30 = smov 128   ;;  %s754_s4 = smov 8  }
 0x22b   :  { %494 = dma.vmem_to_hbm [thread:$0]  %s489_s21, 2048, %s842_s3, [#allocation4], %s753_s30, %s753_s30, %s754_s4  }
 0x22c   :  { %745 = dma.done.wait [#allocation4], 2048  }
 0x22d   :  { %746 = vsyncadd [#allocation4], 4294965248 }
 0x22e   :  { %498 = vsyncpa [#allocation3], 1 }
 0x22f   :  { %499 = vsyncpa [#allocation6], 1 }
 0x230   :  { %500 = vsyncpa [#allocation4], 1 }

</bundles_post_ra>
